<compile_context>
chip_gen: v5e
topology: v5e:2x2
jax: 0.10.0
libtpu: 0.0.40
codegen_flags: <defaults>
</compile_context>

<pallas_src>
import functools

import jax
import jax.numpy as jnp
from jax import lax
from jax.experimental import pallas as pl
from jax.experimental.pallas import tpu as pltpu

BN_EPS = 1e-5
LANE = 128
BF16_SUBLANE = 16   # native bf16 tile is (16, 128)


def _round_up(x, m):
    return ((x + m - 1) // m) * m


def _mlp_kernel(x_ref, w1_ref, gamma_ref, beta_ref, w2_ref, b2_ref, o_ref, *,
                inv_n):
    """Grid axis 0 tiles the hidden dim; partials accumulate into o_ref."""
    j = pl.program_id(0)

    @pl.when(j == 0)
    def _init():
        # Seed the resident f32 output with the second linear's bias; partial
        # products over hidden tiles accumulate on top (no scratch, no
        # finalize pass).
        o_ref[...] = jnp.broadcast_to(b2_ref[...], o_ref.shape)

    # ---- Linear 1 (MXU, bf16 operands, f32 accumulation) ----
    # b1 is intentionally dropped: training-mode BN subtracts the batch mean,
    # so a per-column bias cancels exactly.
    h = jnp.dot(x_ref[...], w1_ref[...], preferred_element_type=jnp.float32)

    # ---- BatchNorm1d (training mode: batch mean, biased batch variance) ----
    # Zero-padded batch rows of x give h == 0 there, so they contribute
    # nothing to the sums; divide by the true batch size (inv_n).
    mean = jnp.sum(h, axis=0, keepdims=True) * inv_n              # [1, tH]
    mean_sq = jnp.sum(h * h, axis=0, keepdims=True) * inv_n
    var = jnp.maximum(mean_sq - mean * mean, 0.0)
    scale = gamma_ref[...] * lax.rsqrt(var + BN_EPS)              # EUP rsqrt
    shift = beta_ref[...] - mean * scale

    # ---- fused scale/shift + ReLU (single VPU pass over [N_pad, tH]) ----
    h_act = jnp.maximum(h * scale + shift, 0.0)

    # ---- Linear 2 (MXU): accumulate partials into the resident output ----
    o_ref[...] += jnp.dot(h_act.astype(jnp.bfloat16), w2_ref[...],
                          preferred_element_type=jnp.float32)


def _vmem_budget_and_limit():
    """Per-generation VMEM budget (for tile choice) and scoped-VMEM limit."""
    try:
        cap = int(pltpu.get_tpu_info().vmem_capacity_bytes)
    except Exception:
        cap = 64 << 20                      # conservative: v7x per-TensorCore
    cap = max(cap, 32 << 20)
    budget = (cap * 3) // 4                 # leave headroom for compiler scratch
    limit = min(budget + (8 << 20), cap - (4 << 20))
    return budget, limit


def _choose_hidden_tile(n_pad, k_pad, o_pad, h_pad, budget_bytes, weight_bufs,
                        hidden_tile=None):
    """Largest lane-multiple hidden tile that fits the VMEM budget."""
    if hidden_tile is not None:
        th_cap = min(h_pad, _round_up(hidden_tile, LANE))
    else:
        # Bytes independent of the hidden tile (conservatively budget the
        # resident x at two buffers; o_ref resident once; b2 double-buffered).
        fixed = 2 * (n_pad * k_pad * 2) + n_pad * o_pad * 4 + 2 * (o_pad * 4)
        # Bytes per 128 hidden columns: streamed bf16 w1/w2 (multi-buffered),
        # f32 gamma/beta (double-buffered), and the in-kernel h (f32) /
        # h_act (bf16) temporaries.
        per128 = 128 * (weight_bufs * 2 * (k_pad + o_pad) + 6 * n_pad + 16)
        avail = budget_bytes - fixed
        max_units = max(1, avail // per128) if avail > 0 else 1
        th_cap = int(min(h_pad, max_units * LANE))
    num_tiles = pl.cdiv(h_pad, th_cap)
    th = _round_up(pl.cdiv(h_pad, num_tiles), LANE)   # even split, <= th_cap
    return th, num_tiles, th * num_tiles


def mlp_forward(x, w1, b1, gamma, beta, w2, b2, *, hidden_tile=None):
    # b1 is accepted for interface parity with nn.Linear but is mathematically
    # irrelevant to the forward output (cancels inside training-mode BN).
    del b1
    n, k = x.shape
    h_dim = w1.shape[1]
    o_dim = w2.shape[1]

    # Lane-dense padded sizes; batch padded to the native bf16 sublane tile.
    n_pad = _round_up(n, BF16_SUBLANE)
    k_pad = _round_up(k, LANE)
    h_pad0 = _round_up(h_dim, LANE)
    o_pad = _round_up(o_dim, LANE)

    budget, vmem_limit = _vmem_budget_and_limit()
    small_batch = n_pad <= 256                 # weight-streaming-bound regime
    weight_bufs = 3 if small_batch else 2
    th, num_h_tiles, h_pad = _choose_hidden_tile(
        n_pad, k_pad, o_pad, h_pad0, budget, weight_bufs, hidden_tile)

    # Zero-padded operands; MXU operands in bf16, BN params / bias in f32.
    # Padded hidden columns have w1 = gamma = beta = 0 -> stay exactly 0
    # through BN/ReLU; padded batch rows of x are 0 -> h rows exactly 0.
    xp = jnp.zeros((n_pad, k_pad), jnp.bfloat16).at[:n, :k].set(
        x.astype(jnp.bfloat16))
    w1p = jnp.zeros((k_pad, h_pad), jnp.bfloat16).at[:k, :h_dim].set(
        w1.astype(jnp.bfloat16))
    w2p = jnp.zeros((h_pad, o_pad), jnp.bfloat16).at[:h_dim, :o_dim].set(
        w2.astype(jnp.bfloat16))
    gp = jnp.zeros((1, h_pad), jnp.float32).at[:, :h_dim].set(gamma)
    bp = jnp.zeros((1, h_pad), jnp.float32).at[:, :h_dim].set(beta)
    b2p = jnp.zeros((1, o_pad), jnp.float32).at[:, :o_dim].set(b2)

    kernel = functools.partial(_mlp_kernel, inv_n=1.0 / n)

    # Streamed-weight specs; deeper buffering only helps when weight DMA is
    # the bottleneck and there are enough hidden tiles to pipeline.
    if small_batch and num_h_tiles >= 3:
        w1_spec = pl.BlockSpec((k_pad, th), lambda j: (0, j),
                               pipeline_mode=pl.Buffered(3))
        w2_spec = pl.BlockSpec((th, o_pad), lambda j: (j, 0),
                               pipeline_mode=pl.Buffered(3))
    else:
        w1_spec = pl.BlockSpec((k_pad, th), lambda j: (0, j))
        w2_spec = pl.BlockSpec((th, o_pad), lambda j: (j, 0))

    cost = pl.CostEstimate(
        flops=2 * n_pad * k_pad * h_pad + 2 * n_pad * h_pad * o_pad
        + 6 * n_pad * h_pad,
        transcendentals=h_pad,
        bytes_accessed=(xp.size + w1p.size + w2p.size) * 2
        + (gp.size + bp.size + b2p.size) * 4
        + n_pad * o_pad * 4,
    )

    out = pl.pallas_call(
        kernel,
        out_shape=jax.ShapeDtypeStruct((n_pad, o_pad), jnp.float32),
        grid_spec=pltpu.PrefetchScalarGridSpec(
            num_scalar_prefetch=0,
            grid=(num_h_tiles,),
            in_specs=[
                pl.BlockSpec((n_pad, k_pad), lambda j: (0, 0)),   # x (resident)
                w1_spec,                                          # w1 cols
                pl.BlockSpec((1, th), lambda j: (0, j)),          # gamma
                pl.BlockSpec((1, th), lambda j: (0, j)),          # beta
                w2_spec,                                          # w2 rows
                pl.BlockSpec((1, o_pad), lambda j: (0, 0)),       # b2
            ],
            out_specs=pl.BlockSpec((n_pad, o_pad), lambda j: (0, 0)),
        ),
        compiler_params=pltpu.CompilerParams(
            dimension_semantics=("arbitrary",),   # hidden axis is a reduction
            vmem_limit_bytes=int(vmem_limit),
        ),
        cost_estimate=cost,
    )(xp, w1p, gp, bp, w2p, b2p)

    return out[:n, :o_dim]


def mlp_reference_f32(x, w1, b1, gamma, beta, w2, b2):
    """Full-f32 reference matching the PyTorch module semantics exactly."""
    h = x @ w1 + b1
    mean = jnp.mean(h, axis=0, keepdims=True)
    var = jnp.mean((h - mean) ** 2, axis=0, keepdims=True)
    h = (h - mean) / jnp.sqrt(var + BN_EPS)
    h = h * gamma + beta
    h = jnp.maximum(h, 0.0)
    return h @ w2 + b2


def mlp_reference_mixed(x, w1, b1, gamma, beta, w2, b2):
    """Mirror of the kernel's precision / algebra (bf16 MXU, b1 dropped)."""
    del b1  # cancels against the batch mean in training-mode BN
    h = jnp.dot(x.astype(jnp.bfloat16), w1.astype(jnp.bfloat16),
                preferred_element_type=jnp.float32)
    mean = jnp.mean(h, axis=0, keepdims=True)
    var = jnp.maximum(jnp.mean(h * h, axis=0, keepdims=True) - mean * mean, 0.0)
    s = gamma * lax.rsqrt(var + BN_EPS)
    t = beta - mean * s
    h = jnp.maximum(h * s + t, 0.0)
    return jnp.dot(h.astype(jnp.bfloat16), w2.astype(jnp.bfloat16),
                   preferred_element_type=jnp.float32) + b2


def init_params(key, input_dim, hidden_dim, output_dim):
    # Deterministic synthetic init (PyTorch-Linear-style uniform bounds).
    k1, k2, k3, k4 = jax.random.split(key, 4)
    bound1 = 1.0 / jnp.sqrt(input_dim)
    bound2 = 1.0 / jnp.sqrt(hidden_dim)
    w1 = jax.random.uniform(k1, (input_dim, hidden_dim), jnp.float32, -bound1, bound1)
    b1 = jax.random.uniform(k2, (1, hidden_dim), jnp.float32, -bound1, bound1)
    w2 = jax.random.uniform(k3, (hidden_dim, output_dim), jnp.float32, -bound2, bound2)
    b2 = jax.random.uniform(k4, (1, output_dim), jnp.float32, -bound2, bound2)
    gamma = jnp.ones((1, hidden_dim), jnp.float32)   # BatchNorm1d.weight
    beta = jnp.zeros((1, hidden_dim), jnp.float32)   # BatchNorm1d.bias
    return w1, b1, gamma, beta, w2, b2


if __name__ == "__main__":
    batch, input_dim, hidden_dim, output_dim = 8, 16, 32, 8

    key = jax.random.PRNGKey(0)
    kx, kp = jax.random.split(key)
    x = jax.random.normal(kx, (batch, input_dim), jnp.float32)
    params = init_params(kp, input_dim, hidden_dim, output_dim)

    out = jax.block_until_ready(mlp_forward(x, *params))
    assert out.shape == (batch, output_dim)

    # Tight check against a reference using the same mixed-precision recipe.
    ref_mixed = mlp_reference_mixed(x, *params)
    assert jnp.allclose(out, ref_mixed, atol=5e-3, rtol=5e-3), \
        "Pallas output mismatch vs mixed-precision reference"

    # Looser check against exact f32 PyTorch-module semantics (with b1); bf16
    # MXU operands are the accepted precision contract (~1e-3..1e-2 deltas).
    ref_f32 = mlp_reference_f32(x, *params)
    assert jnp.allclose(out, ref_f32, atol=5e-2, rtol=5e-2), \
        "Pallas output mismatch vs f32 reference"

    print("KERNEL_OK")
</pallas_src>

<mosaic_0001>
module attributes {stable_mosaic.version = 11 : i64} {
  func.func @_mlp_kernel(%arg0: i32, %arg1: memref<16x128xbf16, #tpu.memory_space<vmem>>, %arg2: memref<128x128xbf16, #tpu.memory_space<vmem>>, %arg3: memref<1x128xf32, #tpu.memory_space<vmem>>, %arg4: memref<1x128xf32, #tpu.memory_space<vmem>>, %arg5: memref<128x128xbf16, #tpu.memory_space<vmem>>, %arg6: memref<1x128xf32, #tpu.memory_space<vmem>>, %arg7: memref<16x128xf32, #tpu.memory_space<vmem>>) attributes {dimension_semantics = [#tpu.dimension_semantics<arbitrary>], iteration_bounds = array<i64: 1>, scalar_prefetch = 0 : i64, scratch_operands = 0 : i64, tpu.core_type = #tpu.core_type<tc>, window_params = [{pipeline_mode = #tpu.pipeline_mode<synchronous>, transform_indices = @transform_0, window_bounds = array<i64: 16, 128>}, {transform_indices = @transform_1, window_bounds = array<i64: 128, 128>}, {transform_indices = @transform_2, window_bounds = array<i64: 1, 128>}, {transform_indices = @transform_3, window_bounds = array<i64: 1, 128>}, {transform_indices = @transform_4, window_bounds = array<i64: 128, 128>}, {pipeline_mode = #tpu.pipeline_mode<synchronous>, transform_indices = @transform_5, window_bounds = array<i64: 1, 128>}, {pipeline_mode = #tpu.pipeline_mode<synchronous>, transform_indices = @transform_6, window_bounds = array<i64: 16, 128>}]} {
    %c0_i32 = arith.constant 0 : i32
    %0 = arith.cmpi eq, %arg0, %c0_i32 : i32
    %1 = arith.extui %0 : i1 to i32
    %c0_i32_0 = arith.constant 0 : i32
    %2 = arith.cmpi ne, %1, %c0_i32_0 : i32
    scf.if %2 {
      %c0_22 = arith.constant 0 : index
      %c0_23 = arith.constant 0 : index
      %39 = vector.load %arg6[%c0_22, %c0_23] : memref<1x128xf32, #tpu.memory_space<vmem>>, vector<1x128xf32>
      %40 = vector.shape_cast %39 : vector<1x128xf32> to vector<1x128xf32>
      %41 = vector.broadcast %40 : vector<1x128xf32> to vector<16x128xf32>
      %c0_24 = arith.constant 0 : index
      %c0_25 = arith.constant 0 : index
      %42 = vector.load %arg7[%c0_24, %c0_25] : memref<16x128xf32, #tpu.memory_space<vmem>>, vector<16x128xf32>
      tpu.vector_store %arg7[%c0_24, %c0_25], %41 {strides = array<i32>} : memref<16x128xf32, #tpu.memory_space<vmem>>, vector<16x128xf32>,
    } else {
    }
    %c0 = arith.constant 0 : index
    %c0_1 = arith.constant 0 : index
    %3 = vector.load %arg1[%c0, %c0_1] : memref<16x128xbf16, #tpu.memory_space<vmem>>, vector<16x128xbf16>
    %c0_2 = arith.constant 0 : index
    %c0_3 = arith.constant 0 : index
    %4 = vector.load %arg2[%c0_2, %c0_3] : memref<128x128xbf16, #tpu.memory_space<vmem>>, vector<128x128xbf16>
    %cst = arith.constant dense<0.000000e+00> : vector<16x128xf32>
    %5 = tpu.matmul %3, %4, %cst {dimension_numbers = #tpu.dot_dimension_numbers<[1], [0], [0], [1], [0, 0, 1, 1], [], []>} : vector<16x128xbf16>, vector<128x128xbf16>, vector<16x128xf32> -> vector<16x128xf32>
    %cst_4 = arith.constant dense<0.000000e+00> : vector<128xf32>
    %6 = vector.multi_reduction <add>, %5, %cst_4 [0] : vector<16x128xf32> to vector<128xf32>
    %7 = vector.shape_cast %6 : vector<128xf32> to vector<1x128xf32>
    %cst_5 = arith.constant 1.250000e-01 : f32
    %8 = vector.broadcast %cst_5 : f32 to vector<1x128xf32>
    %9 = arith.mulf %7, %8 : vector<1x128xf32>
    %10 = arith.mulf %5, %5 : vector<16x128xf32>
    %cst_6 = arith.constant dense<0.000000e+00> : vector<128xf32>
    %11 = vector.multi_reduction <add>, %10, %cst_6 [0] : vector<16x128xf32> to vector<128xf32>
    %12 = vector.shape_cast %11 : vector<128xf32> to vector<1x128xf32>
    %cst_7 = arith.constant 1.250000e-01 : f32
    %13 = vector.broadcast %cst_7 : f32 to vector<1x128xf32>
    %14 = arith.mulf %12, %13 : vector<1x128xf32>
    %15 = arith.mulf %9, %9 : vector<1x128xf32>
    %16 = arith.subf %14, %15 : vector<1x128xf32>
    %cst_8 = arith.constant 0.000000e+00 : f32
    %17 = vector.broadcast %cst_8 : f32 to vector<1x128xf32>
    %18 = arith.maximumf %16, %17 : vector<1x128xf32>
    %c0_9 = arith.constant 0 : index
    %c0_10 = arith.constant 0 : index
    %19 = vector.load %arg3[%c0_9, %c0_10] : memref<1x128xf32, #tpu.memory_space<vmem>>, vector<1x128xf32>
    %cst_11 = arith.constant 9.99999974E-6 : f32
    %20 = vector.broadcast %cst_11 : f32 to vector<1x128xf32>
    %21 = arith.addf %18, %20 : vector<1x128xf32>
    %22 = math.rsqrt %21 : vector<1x128xf32>
    %23 = arith.mulf %19, %22 : vector<1x128xf32>
    %c0_12 = arith.constant 0 : index
    %c0_13 = arith.constant 0 : index
    %24 = vector.load %arg4[%c0_12, %c0_13] : memref<1x128xf32, #tpu.memory_space<vmem>>, vector<1x128xf32>
    %25 = arith.mulf %9, %23 : vector<1x128xf32>
    %26 = arith.subf %24, %25 : vector<1x128xf32>
    %27 = vector.broadcast %23 : vector<1x128xf32> to vector<16x128xf32>
    %28 = arith.mulf %5, %27 : vector<16x128xf32>
    %29 = vector.broadcast %26 : vector<1x128xf32> to vector<16x128xf32>
    %30 = arith.addf %28, %29 : vector<16x128xf32>
    %cst_14 = arith.constant 0.000000e+00 : f32
    %31 = vector.broadcast %cst_14 : f32 to vector<16x128xf32>
    %32 = arith.maximumf %30, %31 : vector<16x128xf32>
    %c0_15 = arith.constant 0 : index
    %c0_16 = arith.constant 0 : index
    %33 = vector.load %arg7[%c0_15, %c0_16] : memref<16x128xf32, #tpu.memory_space<vmem>>, vector<16x128xf32>
    %34 = arith.truncf %32 : vector<16x128xf32> to vector<16x128xbf16>
    %c0_17 = arith.constant 0 : index
    %c0_18 = arith.constant 0 : index
    %35 = vector.load %arg5[%c0_17, %c0_18] : memref<128x128xbf16, #tpu.memory_space<vmem>>, vector<128x128xbf16>
    %cst_19 = arith.constant dense<0.000000e+00> : vector<16x128xf32>
    %36 = tpu.matmul %34, %35, %cst_19 {dimension_numbers = #tpu.dot_dimension_numbers<[1], [0], [0], [1], [0, 0, 1, 1], [], []>} : vector<16x128xbf16>, vector<128x128xbf16>, vector<16x128xf32> -> vector<16x128xf32>
    %37 = arith.addf %33, %36 : vector<16x128xf32>
    %c0_20 = arith.constant 0 : index
    %c0_21 = arith.constant 0 : index
    %38 = vector.load %arg7[%c0_20, %c0_21] : memref<16x128xf32, #tpu.memory_space<vmem>>, vector<16x128xf32>
    tpu.vector_store %arg7[%c0_20, %c0_21], %37 {strides = array<i32>} : memref<16x128xf32, #tpu.memory_space<vmem>>, vector<16x128xf32>,
    return
  }
  func.func @transform_0(%arg0: i32) -> (i32, i32) {
    %c0_i32 = arith.constant 0 : i32
    %c0_i32_0 = arith.constant 0 : i32
    %c0_i32_1 = arith.constant 0 : i32
    return %c0_i32, %c0_i32_0 : i32, i32
  }
  func.func @transform_1(%arg0: i32) -> (i32, i32) {
    %c0_i32 = arith.constant 0 : i32
    %c0_i32_0 = arith.constant 0 : i32
    return %c0_i32, %arg0 : i32, i32
  }
  func.func @transform_2(%arg0: i32) -> (i32, i32) {
    %c0_i32 = arith.constant 0 : i32
    %c0_i32_0 = arith.constant 0 : i32
    return %c0_i32, %arg0 : i32, i32
  }
  func.func @transform_3(%arg0: i32) -> (i32, i32) {
    %c0_i32 = arith.constant 0 : i32
    %c0_i32_0 = arith.constant 0 : i32
    return %c0_i32, %arg0 : i32, i32
  }
  func.func @transform_4(%arg0: i32) -> (i32, i32) {
    %c0_i32 = arith.constant 0 : i32
    %c0_i32_0 = arith.constant 0 : i32
    return %arg0, %c0_i32 : i32, i32
  }
  func.func @transform_5(%arg0: i32) -> (i32, i32) {
    %c0_i32 = arith.constant 0 : i32
    %c0_i32_0 = arith.constant 0 : i32
    %c0_i32_1 = arith.constant 0 : i32
    return %c0_i32, %c0_i32_0 : i32, i32
  }
  func.func @transform_6(%arg0: i32) -> (i32, i32) {
    %c0_i32 = arith.constant 0 : i32
    %c0_i32_0 = arith.constant 0 : i32
    %c0_i32_1 = arith.constant 0 : i32
    return %c0_i32, %c0_i32_0 : i32, i32
  }
}

</mosaic_0001>

<bundles_post_ra>
// kernel: tpu_custom_call.1
= control target key start
LH: loop header
LB: loop body
LE: loop exit
PB: predicated region body
PF: predicated region fallthrough
CT: control target
= control target key end

     0   :  { %11 = vsyncpa [#allocation3], 0  ;;  %s583_s0 = inlined_call_operand.hbm [shape: bf16[16,128], index: 0, kind: input, shape index: {}]   ;;  %s584_s1 = inlined_call_operand.hbm [shape: bf16[128,128], index: 1, kind: input, shape index: {}]   ;;  %s585_s2 = inlined_call_operand.vmem [shape: f32[1,128], index: 2, kind: input, shape index: {}]   ;;  %s586_s3 = inlined_call_operand.vmem [shape: f32[1,128], index: 3, kind: input, shape index: {}]   ;;  %s587_s4 = inlined_call_operand.hbm [shape: bf16[128,128], index: 4, kind: input, shape index: {}]   ;;  %s588_s5 = inlined_call_operand.vmem [shape: f32[1,128], index: 5, kind: input, shape index: {}]   ;;  %s589_s6 = inlined_call_operand.hbm [shape: f32[16,128], index: 6, kind: output, shape index: {}]  }
   0x1   :  { %12 = vsyncpa [#allocation6], 0 }
   0x2   :  { %13 = vsyncpa [#allocation4], 0  ;;  %s31_s23 = sshll.u32 %s584_s1, 4  ;;  %s519_s24 = smov [#allocation5]   ;;  %s32_s23 = int_to_ptr.hbm [resolvable:$true] %s31_s23 }
   0x3   :  { %s33_s25 = sshll.u32 %s519_s24, 4  ;;  %s18_s28 = sshll.u32 %s583_s0, 4  ;;  %s34_s25 = int_to_ptr.vmem [resolvable:$true] %s33_s25  ;;  %s19_s28 = int_to_ptr.hbm [resolvable:$true] %s18_s28 }
   0x4   :  { %s520_s29 = smov 64   ;;  %s521_s30 = smov 4  }
   0x5   :  { %39 = dma.hbm_to_vmem [thread:$0]  %s32_s23, 1024, %s34_s25, [#allocation6], %s520_s29, %s520_s29, %s521_s30  }
   0x6   :  { %s522_s7 = smov [#allocation2]   ;;  %s48_s11 = sshll.u32 %s587_s4, 4  ;;  %s49_s11 = int_to_ptr.hbm [resolvable:$true] %s48_s11 }
   0x7   :  { %s20_s8 = sshll.u32 %s522_s7, 4  ;;  %s523_s1 = smov [#allocation7]   ;;  %s21_s8 = int_to_ptr.vmem [resolvable:$true] %s20_s8 }
   0x8   :  { %26 = dma.hbm_to_vmem [thread:$0]  %s19_s28, 128, %s21_s8, [#allocation3], %s520_s29, %s520_s29, %s521_s30  }
   0x9   :  { %s50_s12 = sshll.u32 %s523_s1, 4  ;;  %s51_s12 = int_to_ptr.vmem [resolvable:$true] %s50_s12 }
   0xa   :  { %56 = dma.hbm_to_vmem [thread:$0]  %s49_s11, 1024, %s51_s12, [#allocation6], %s520_s29, %s520_s29, %s521_s30  }
   0xb   :  { %513 = dma.done.wait [#allocation3], 128  }
   0xc   :  { %514 = vsyncadd [#allocation3], 4294967168 }
   0xd   :  { %515 = dma.done.wait [#allocation6], 2048  }
   0xe   :  { %516 = vsyncadd [#allocation6], 4294965248  ;;  %v397_v0 = vld [vmem:[#allocation5 + $0x38] sm:$0xff]  ;;  %v396_v1 = vld [vmem:[#allocation5 + $0x30] sm:$0xff]  ;;  %s307_s19 = sshll.u32 %s589_s6, 4  ;;  %s525_s20 = smov 128   ;;  %s308_s19 = int_to_ptr.hbm [resolvable:$true] %s307_s19 }
   0xf   :  { %153 = vmatpush.bf16.msra.mxu0 %v397_v0  ;;  %v395_v2 = vld [vmem:[#allocation5 + $0x28] sm:$0xff]  ;;  %v394_v3 = vld [vmem:[#allocation5 + $0x20] sm:$0xff]  ;;  %v393_v4 = vld [vmem:[#allocation5 + $0x18] sm:$0xff]  ;;  %s526_s21 = smov 8  }
  0x10   :  { %v392_v5 = vld [vmem:[#allocation5 + $0x10] sm:$0xff]  ;;  %v391_v6 = vld [vmem:[#allocation5 + $0x8] sm:$0xff]  ;;  %v390_v7 = vld [vmem:[#allocation5] sm:$0xff] }
  0x11   :  { %v389_v8 = vld [vmem:[#allocation2] sm:$0xff]  ;;  %v404_v11 = vld [vmem:[#allocation7 + $0x30] sm:$0xff]  ;;  %v403_v13 = vld [vmem:[#allocation7 + $0x28] sm:$0xff] }
  0x12   :  { %v405_v10 = vld [vmem:[#allocation7 + $0x38] sm:$0xff]  ;;  %v402_v19 = vld [vmem:[#allocation7 + $0x20] sm:$0xff]  ;;  %v400_v29 = vld [vmem:[#allocation7 + $0x10] sm:$0xff] }
  0x13   :  { %154 = vmatpush.bf16.msra.mxu0 %v396_v1  ;;  %283 = vmatpush.bf16.msra.mxu1 %v405_v10  ;;  %v401_v24 = vld [vmem:[#allocation7 + $0x18] sm:$0xff]  ;;  %v399_v34 = vld [vmem:[#allocation7 + $0x8] sm:$0xff]  ;;  %v398_v38 = vld [vmem:[#allocation7] sm:$0xff] }
  0x14   :  { %v188_v46 = vld [vmem:[%s585_s2] sm:$0x1] }
  0x15   :  { %v201_v50 = vld [vmem:[%s586_s3] sm:$0x1]  ;;  %s524_s3 = smov [#allocation8]  }
  0x16   :  { %v414_v62 = vld [vmem:[%s588_s5] ss:$0 sm:$0xff]  ;;  %s305_s16 = sshll.u32 %s524_s3, 4  ;;  %s306_s16 = int_to_ptr.vmem [resolvable:$true] %s305_s16 }
  0x17   :  { %155 = vmatpush.bf16.msra.mxu0 %v395_v2  ;;  %284 = vmatpush.bf16.msra.mxu1 %v404_v11 }
  0x1b   :  { %156 = vmatpush.bf16.msra.mxu0 %v394_v3  ;;  %285 = vmatpush.bf16.msra.mxu1 %v403_v13 }
  0x1f   :  { %157 = vmatpush.bf16.msra.mxu0 %v393_v4  ;;  %286 = vmatpush.bf16.msra.mxu1 %v402_v19 }
  0x23   :  { %158 = vmatpush.bf16.msra.mxu0 %v392_v5  ;;  %287 = vmatpush.bf16.msra.mxu1 %v401_v24 }
  0x27   :  { %159 = vmatpush.bf16.msra.mxu0 %v391_v6  ;;  %288 = vmatpush.bf16.msra.mxu1 %v400_v29 }
  0x2b   :  { %160 = vmatpush.bf16.msra.mxu0 %v390_v7  ;;  %289 = vmatpush.bf16.msra.mxu1 %v399_v34 }
  0x2e   :  { %161 = vmatmul.bf16.vlgmr.msra.gmra.mxu0 %v389_v8 }
  0x2f   :  { %290 = vmatpush.bf16.msra.mxu1 %v398_v38 }
  0xab   :  { %v162_v9 = vpop.f32.mrf.mxu0 }
  0xac   :  { %v175_v14 = vmul.f32 %v162_v9, %v162_v9 }
  0xb3   :  { %v164_v12 = vpop.f32.mrf.mxu0 }
  0xb4   :  { %v167_v15 = vadd.f32 %v164_v12, %v162_v9  ;;  %v176_v16 = vmul.f32 %v164_v12, %v164_v12 }
  0xb6   :  { %v168_v17 = vrot.slane %v167_v15, 4  ;;  %v177_v18 = vadd.f32 %v176_v16, %v175_v14 }
  0xb8   :  { %v169_v20 = vadd.f32 %v168_v17, %v167_v15  ;;  %v178_v21 = vrot.slane %v177_v18, 4 }
  0xba   :  { %v170_v22 = vrot.slane %v169_v20, 2  ;;  %v179_v23 = vadd.f32 %v178_v21, %v177_v18 }
  0xbc   :  { %v171_v25 = vadd.f32 %v170_v22, %v169_v20  ;;  %v180_v26 = vrot.slane %v179_v23, 2 }
  0xbe   :  { %v172_v27 = vrot.slane %v171_v25, 1  ;;  %v181_v28 = vadd.f32 %v180_v26, %v179_v23 }
  0xc0   :  { %v173_v30 = vadd.f32 %v172_v27, %v171_v25  ;;  %v182_v31 = vrot.slane %v181_v28, 1 }
  0xc2   :  { %v174_v32 = vmul.f32 0.125, %v173_v30  ;;  %v183_v33 = vadd.f32 %v182_v31, %v181_v28 }
  0xc4   :  { %v184_v35 = vmul.f32 0.125, %v183_v33  ;;  %v185_v36 = vmul.f32 %v174_v32, %v174_v32 }
  0xc6   :  { %v186_v37 = vsub.f32 %v184_v35, %v185_v36 }
  0xc8   :  { %v187_v39 = vmax.f32 %v186_v37, 0.0 }
  0xca   :  { %v189_v40 = vadd.f32 1e-05, %v187_v39 }
  0xcc   :  { %415 = vrsqrt.f32 %v189_v40  ;;  %vm196_vm1 = vweird.f32 %v189_v40 }
  0xd2   :  { %v416_v41 = vpop.eup %415 }
  0xd3   :  { %v191_v42 = vmul.f32 %v416_v41, %v189_v40  ;;  %vm197_vm0 = vweird.f32 %v416_v41 }
  0xd4   :  { %vm198_vm2 = vmor %vm196_vm1, %vm197_vm0 }
  0xd5   :  { %v192_v43 = vmul.f32 %v416_v41, %v191_v42 }
  0xd7   :  { %v193_v44 = vmul.f32 0.5, %v192_v43 }
  0xd9   :  { %v194_v45 = vsub.f32 1.5, %v193_v44 }
  0xdb   :  { %v195_v47 = vmul.f32 %v416_v41, %v194_v45 }
  0xdd   :  { %v199_v48 = vsel %vm198_vm2, %v416_v41, %v195_v47 }
  0xde   :  { %v200_v49 = vmul.f32 %v199_v48, %v188_v46 }
  0xe0   :  { %v202_v51 = vmul.f32 %v200_v49, %v174_v32  ;;  %v205_v52 = vperm.slane %v200_v49, 0 }
  0xe2   :  { %v203_v53 = vsub.f32 %v201_v50, %v202_v51  ;;  %v207_v54 = vmul.f32 %v205_v52, %v162_v9  ;;  %v208_v55 = vmul.f32 %v205_v52, %v164_v12 }
  0xe4   :  { %v210_v56 = vperm.slane %v203_v53, 0 }
  0xe6   :  { %v213_v57 = vadd.f32 %v210_v56, %v208_v55  ;;  %v212_v58 = vadd.f32 %v210_v56, %v207_v54 }
  0xe8   :  { %v214_v59 = vmax.f32 %v212_v58, 0.0  ;;  %v215_v60 = vmax.f32 %v213_v57, 0.0 }
  0xea   :  { %v218_v61 = vpack.c.bf16 %v215_v60, %v214_v59 }
  0xec   :  { %291 = vmatmul.bf16.vlgmr.msra.gmra.mxu1 %v218_v61 }
 0x169   :  { %v292_v63 = vpop.f32.mrf.mxu1 }
 0x16a   :  { %v297_v0 = vadd.f32 %v414_v62, %v292_v63 }
 0x16c   :  { %299 = vst [vmem:[#allocation8] sm:$0xff] %v297_v0 }
 0x171   :  { %v294_v1 = vpop.f32.mrf.mxu1 }
 0x172   :  { %v298_v2 = vadd.f32 %v414_v62, %v294_v1 }
 0x174   :  { %300 = vst [vmem:[#allocation8 + $0x8] sm:$0xff] %v298_v2 }
 0x175   :  { %313 = dma.vmem_to_hbm [thread:$0]  %s306_s16, 256, %s308_s19, [#allocation4], %s525_s20, %s525_s20, %s526_s21  }
 0x176   :  { %517 = dma.done.wait [#allocation4], 256  }
 0x177   :  { %518 = vsyncadd [#allocation4], 4294967040 }
 0x178   :  { %318 = vsyncpa [#allocation3], 1 }
 0x179   :  { %319 = vsyncpa [#allocation6], 1 }
 0x17a   :  { %320 = vsyncpa [#allocation4], 1 }

</bundles_post_ra>
